<compile_context>
chip_gen: v7x
topology: tpu7x:2x2x1
jax: 0.10.0
libtpu: 0.0.40
codegen_flags: <defaults>
</compile_context>

<pallas_src>
import jax
import jax.numpy as jnp
from jax.experimental import pallas as pl
from jax.experimental.pallas import tpu as pltpu


def _dice_sums_kernel(x_ref, t_ref, out_ref, inter_acc, p_acc, g_acc):
    """One grid step: softmax over channels + per-class partial reductions.

    x_ref, t_ref : (Bt, C, HWt) VMEM tiles (native dtype; upcast here)
    out_ref      : (1, 3, C) per-core output slice, written once per core slab
    *_acc        : (C, HWt) f32 VMEM scratch; lane-resident partial sums
    """
    b = pl.program_id(1)
    h = pl.program_id(2)
    nb = pl.num_programs(1)
    nh = pl.num_programs(2)

    @pl.when((b == 0) & (h == 0))
    def _():
        zeros = jnp.zeros_like(inter_acc)
        inter_acc[...] = zeros
        p_acc[...] = zeros
        g_acc[...] = zeros

    x = x_ref[...].astype(jnp.float32)   # (Bt, C, HWt)
    g = t_ref[...].astype(jnp.float32)   # (Bt, C, HWt)

    # softmax over the channel axis (axis=1), matching torch.softmax(input, dim=1).
    # Channel max/sum are cross-sublane (XLU) reductions; exp + reciprocal go to
    # the EUP slot.  Exact reciprocal keeps parity with the reference softmax.
    m = jnp.max(x, axis=1, keepdims=True)
    e = jnp.exp(x - m)
    p = e * pl.reciprocal(jnp.sum(e, axis=1, keepdims=True))

    # Keep the lane axis; only reduce the small batch-tile axis per step.  The
    # cross-lane (XLU) reduction is deferred to the single final store below.
    inter_acc[...] += jnp.sum(p * g, axis=0)   # (C, HWt)
    p_acc[...] += jnp.sum(p, axis=0)           # (C, HWt)
    g_acc[...] += jnp.sum(g, axis=0)           # (C, HWt)

    @pl.when((b == nb - 1) & (h == nh - 1))
    def _():
        out_ref[0] = jnp.stack(
            [jnp.sum(inter_acc[...], axis=-1),
             jnp.sum(p_acc[...], axis=-1),
             jnp.sum(g_acc[...], axis=-1)],
            axis=0)                             # (3, C), written once per core


def _choose_tiles(N, C, HW, itemsize, target_bytes=2 << 20):
    """Pick (batch_tile, hw_tile) aiming at ~target_bytes per input tile."""
    # Spatial tile: a multiple of 128 that divides HW (else the full HW).
    if HW % 128 == 0 and C * HW * itemsize > target_bytes:
        hwt = 128
        d = 128
        while d <= HW:
            if HW % d == 0 and C * d * itemsize <= target_bytes:
                hwt = d
            d += 128
    else:
        hwt = HW
    # Batch tile: as many elements as fit the byte budget, dividing N evenly.
    per_elem = C * hwt * itemsize
    bt = max(1, min(N, target_bytes // max(per_elem, 1)))
    while N % bt != 0:
        bt -= 1
    return int(bt), int(hwt)


def dice_loss(logits, target, class_weights=1.0, eps=1e-7):
    """logits, target: (N, C, H, W).  Matches DiceLoss.forward."""
    del class_weights  # present in the PyTorch module's __init__ but unused in forward
    N, C, H, W = logits.shape
    HW = H * W

    # Keep the native dtype for the HBM->VMEM DMA; upcast to f32 inside the kernel.
    x2 = logits.reshape(N, C, HW)
    t2 = target.reshape(N, C, HW)

    itemsize = max(jnp.dtype(x2.dtype).itemsize, jnp.dtype(t2.dtype).itemsize)
    bt, hwt = _choose_tiles(N, C, HW, itemsize)
    nb = N // bt
    nhw = HW // hwt

    # Split the batch-block axis across the two TensorCores on v7x (megacore).
    # On single-TC v5e/v6e this is just an outer loop of size <= 2; each core /
    # loop slab gets its own scratch + (3, C) output row, summed in the wrapper.
    ncores = 2 if (nb >= 2 and nb % 2 == 0) else 1
    nb_per_core = nb // ncores

    # Explicit VMEM budget: 2 inputs x 2 pipeline buffers (sublane-padded for
    # small C), f32 intermediates, lane-resident scratch, plus slack.  Clamp
    # well under v7x's 64 MiB physical VMEM.
    tile_bytes = bt * max(C, 8) * hwt * itemsize
    f32_tile_bytes = bt * max(C, 8) * hwt * 4
    scratch_bytes = 3 * max(C, 8) * hwt * 4
    vmem_limit = int(min(max(4 * tile_bytes + 6 * f32_tile_bytes + scratch_bytes
                             + (4 << 20), 32 << 20), 48 << 20))

    part = pl.pallas_call(
        _dice_sums_kernel,
        out_shape=jax.ShapeDtypeStruct((ncores, 3, C), jnp.float32),
        grid_spec=pltpu.PrefetchScalarGridSpec(
            num_scalar_prefetch=0,
            grid=(ncores, nb_per_core, nhw),
            in_specs=[
                pl.BlockSpec((bt, C, hwt),
                             lambda c, b, h: (c * nb_per_core + b, 0, h)),
                pl.BlockSpec((bt, C, hwt),
                             lambda c, b, h: (c * nb_per_core + b, 0, h)),
            ],
            out_specs=pl.BlockSpec((1, 3, C), lambda c, b, h: (c, 0, 0)),
            scratch_shapes=[pltpu.VMEM((C, hwt), jnp.float32)] * 3,
        ),
        compiler_params=pltpu.CompilerParams(
            dimension_semantics=("parallel", "arbitrary", "arbitrary"),
            vmem_limit_bytes=vmem_limit,
        ),
    )(x2, t2)

    sums = jnp.sum(part, axis=0)                 # (3, C): sum per-core partials
    inter, sum_p, sum_g = sums[0], sums[1], sums[2]
    union = sum_p + sum_g - inter
    iou = (inter + eps) / (union + eps)
    return jnp.sum(1.0 - iou[1:])                # classes 1..C-1, as in the torch loop


def _dice_loss_ref(logits, target, eps=1e-7):
    """Pure-JAX reference for correctness checking."""
    p = jax.nn.softmax(logits.astype(jnp.float32), axis=1)
    g = target.astype(jnp.float32)
    losses = 0.0
    for i in range(1, logits.shape[1]):
        ypr, ygt = p[:, i], g[:, i]
        inter = jnp.sum(ypr * ygt)
        union = jnp.sum(ypr) + jnp.sum(ygt) - inter
        losses += 1.0 - (inter + eps) / (union + eps)
    return losses


if __name__ == "__main__":
    key = jax.random.PRNGKey(0)
    k1, k2 = jax.random.split(key)

    N, C, H, W = 2, 4, 16, 16
    logits = jax.random.normal(k1, (N, C, H, W), dtype=jnp.float32)
    # target: one-hot per-pixel class masks in NCHW, like segmentation ground truth
    labels = jax.random.randint(k2, (N, H, W), 0, C)
    target = jax.nn.one_hot(labels, C, axis=1).astype(jnp.float32)  # (N, C, H, W)

    loss = jax.block_until_ready(dice_loss(logits, target))
    ref = _dice_loss_ref(logits, target)
    assert jnp.allclose(loss, ref, rtol=1e-5, atol=1e-5), (loss, ref)

    print("KERNEL_OK")
</pallas_src>

<mosaic_0001>
module attributes {stable_mosaic.version = 11 : i64} {
  func.func @_dice_sums_kernel(%arg0: i32, %arg1: i32, %arg2: i32, %arg3: memref<2x4x256xf32, #tpu.memory_space<vmem>>, %arg4: memref<2x4x256xf32, #tpu.memory_space<vmem>>, %arg5: memref<1x3x4xf32, #tpu.memory_space<vmem>>, %arg6: memref<4x256xf32, #tpu.memory_space<vmem>>, %arg7: memref<4x256xf32, #tpu.memory_space<vmem>>, %arg8: memref<4x256xf32, #tpu.memory_space<vmem>>) attributes {dimension_semantics = [#tpu.dimension_semantics<parallel>, #tpu.dimension_semantics<arbitrary>, #tpu.dimension_semantics<arbitrary>], iteration_bounds = array<i64: 1, 1, 1>, scalar_prefetch = 0 : i64, scratch_operands = 3 : i64, tpu.core_type = #tpu.core_type<tc>, window_params = [{transform_indices = @transform_0, window_bounds = array<i64: 2, 4, 256>}, {transform_indices = @transform_1, window_bounds = array<i64: 2, 4, 256>}, {transform_indices = @transform_2, window_bounds = array<i64: 1, 3, 4>}]} {
    %c0_i32 = arith.constant 0 : i32
    %0 = arith.cmpi eq, %arg1, %c0_i32 : i32
    %c0_i32_0 = arith.constant 0 : i32
    %1 = arith.cmpi eq, %arg2, %c0_i32_0 : i32
    %2 = arith.andi %0, %1 : i1
    %3 = arith.extui %2 : i1 to i32
    %c0_i32_1 = arith.constant 0 : i32
    %4 = arith.cmpi ne, %3, %c0_i32_1 : i32
    scf.if %4 {
      %cst_26 = arith.constant 0.000000e+00 : f32
      %35 = vector.broadcast %cst_26 : f32 to vector<4x256xf32>
      %c0_27 = arith.constant 0 : index
      %c0_28 = arith.constant 0 : index
      %36 = vector.load %arg6[%c0_27, %c0_28] : memref<4x256xf32, #tpu.memory_space<vmem>>, vector<4x256xf32>
      tpu.vector_store %arg6[%c0_27, %c0_28], %35 {strides = array<i32>} : memref<4x256xf32, #tpu.memory_space<vmem>>, vector<4x256xf32>,
      %c0_29 = arith.constant 0 : index
      %c0_30 = arith.constant 0 : index
      %37 = vector.load %arg7[%c0_29, %c0_30] : memref<4x256xf32, #tpu.memory_space<vmem>>, vector<4x256xf32>
      tpu.vector_store %arg7[%c0_29, %c0_30], %35 {strides = array<i32>} : memref<4x256xf32, #tpu.memory_space<vmem>>, vector<4x256xf32>,
      %c0_31 = arith.constant 0 : index
      %c0_32 = arith.constant 0 : index
      %38 = vector.load %arg8[%c0_31, %c0_32] : memref<4x256xf32, #tpu.memory_space<vmem>>, vector<4x256xf32>
      tpu.vector_store %arg8[%c0_31, %c0_32], %35 {strides = array<i32>} : memref<4x256xf32, #tpu.memory_space<vmem>>, vector<4x256xf32>,
    } else {
    }
    %c0 = arith.constant 0 : index
    %c0_2 = arith.constant 0 : index
    %c0_3 = arith.constant 0 : index
    %5 = vector.load %arg3[%c0, %c0_2, %c0_3] : memref<2x4x256xf32, #tpu.memory_space<vmem>>, vector<2x4x256xf32>
    %c0_4 = arith.constant 0 : index
    %c0_5 = arith.constant 0 : index
    %c0_6 = arith.constant 0 : index
    %6 = vector.load %arg4[%c0_4, %c0_5, %c0_6] : memref<2x4x256xf32, #tpu.memory_space<vmem>>, vector<2x4x256xf32>
    %cst = arith.constant dense<0xFF800000> : vector<2x256xf32>
    %7 = vector.multi_reduction <maximumf>, %5, %cst [1] : vector<2x4x256xf32> to vector<2x256xf32>
    %8 = vector.shape_cast %7 : vector<2x256xf32> to vector<2x1x256xf32>
    %9 = vector.broadcast %8 : vector<2x1x256xf32> to vector<2x4x256xf32>
    %10 = arith.subf %5, %9 : vector<2x4x256xf32>
    %11 = math.exp %10 : vector<2x4x256xf32>
    %cst_7 = arith.constant dense<0.000000e+00> : vector<2x256xf32>
    %12 = vector.multi_reduction <add>, %11, %cst_7 [1] : vector<2x4x256xf32> to vector<2x256xf32>
    %13 = vector.shape_cast %12 : vector<2x256xf32> to vector<2x1x256xf32>
    %14 = tpu.reciprocal %13 : vector<2x1x256xf32> -> vector<2x1x256xf32>
    %15 = vector.broadcast %14 : vector<2x1x256xf32> to vector<2x4x256xf32>
    %16 = arith.mulf %11, %15 : vector<2x4x256xf32>
    %c0_8 = arith.constant 0 : index
    %c0_9 = arith.constant 0 : index
    %17 = vector.load %arg6[%c0_8, %c0_9] : memref<4x256xf32, #tpu.memory_space<vmem>>, vector<4x256xf32>
    %18 = arith.mulf %16, %6 : vector<2x4x256xf32>
    %cst_10 = arith.constant dense<0.000000e+00> : vector<4x256xf32>
    %19 = vector.multi_reduction <add>, %18, %cst_10 [0] : vector<2x4x256xf32> to vector<4x256xf32>
    %20 = arith.addf %17, %19 : vector<4x256xf32>
    %c0_11 = arith.constant 0 : index
    %c0_12 = arith.constant 0 : index
    %21 = vector.load %arg6[%c0_11, %c0_12] : memref<4x256xf32, #tpu.memory_space<vmem>>, vector<4x256xf32>
    tpu.vector_store %arg6[%c0_11, %c0_12], %20 {strides = array<i32>} : memref<4x256xf32, #tpu.memory_space<vmem>>, vector<4x256xf32>,
    %c0_13 = arith.constant 0 : index
    %c0_14 = arith.constant 0 : index
    %22 = vector.load %arg7[%c0_13, %c0_14] : memref<4x256xf32, #tpu.memory_space<vmem>>, vector<4x256xf32>
    %cst_15 = arith.constant dense<0.000000e+00> : vector<4x256xf32>
    %23 = vector.multi_reduction <add>, %16, %cst_15 [0] : vector<2x4x256xf32> to vector<4x256xf32>
    %24 = arith.addf %22, %23 : vector<4x256xf32>
    %c0_16 = arith.constant 0 : index
    %c0_17 = arith.constant 0 : index
    %25 = vector.load %arg7[%c0_16, %c0_17] : memref<4x256xf32, #tpu.memory_space<vmem>>, vector<4x256xf32>
    tpu.vector_store %arg7[%c0_16, %c0_17], %24 {strides = array<i32>} : memref<4x256xf32, #tpu.memory_space<vmem>>, vector<4x256xf32>,
    %c0_18 = arith.constant 0 : index
    %c0_19 = arith.constant 0 : index
    %26 = vector.load %arg8[%c0_18, %c0_19] : memref<4x256xf32, #tpu.memory_space<vmem>>, vector<4x256xf32>
    %cst_20 = arith.constant dense<0.000000e+00> : vector<4x256xf32>
    %27 = vector.multi_reduction <add>, %6, %cst_20 [0] : vector<2x4x256xf32> to vector<4x256xf32>
    %28 = arith.addf %26, %27 : vector<4x256xf32>
    %c0_21 = arith.constant 0 : index
    %c0_22 = arith.constant 0 : index
    %29 = vector.load %arg8[%c0_21, %c0_22] : memref<4x256xf32, #tpu.memory_space<vmem>>, vector<4x256xf32>
    tpu.vector_store %arg8[%c0_21, %c0_22], %28 {strides = array<i32>} : memref<4x256xf32, #tpu.memory_space<vmem>>, vector<4x256xf32>,
    %c0_i32_23 = arith.constant 0 : i32
    %30 = arith.cmpi eq, %arg1, %c0_i32_23 : i32
    %c0_i32_24 = arith.constant 0 : i32
    %31 = arith.cmpi eq, %arg2, %c0_i32_24 : i32
    %32 = arith.andi %30, %31 : i1
    %33 = arith.extui %32 : i1 to i32
    %c0_i32_25 = arith.constant 0 : i32
    %34 = arith.cmpi ne, %33, %c0_i32_25 : i32
    scf.if %34 {
      %c0_26 = arith.constant 0 : index
      %c0_27 = arith.constant 0 : index
      %35 = vector.load %arg6[%c0_26, %c0_27] : memref<4x256xf32, #tpu.memory_space<vmem>>, vector<4x256xf32>
      %cst_28 = arith.constant dense<0.000000e+00> : vector<4xf32>
      %36 = vector.multi_reduction <add>, %35, %cst_28 [1] : vector<4x256xf32> to vector<4xf32>
      %c0_29 = arith.constant 0 : index
      %c0_30 = arith.constant 0 : index
      %37 = vector.load %arg7[%c0_29, %c0_30] : memref<4x256xf32, #tpu.memory_space<vmem>>, vector<4x256xf32>
      %cst_31 = arith.constant dense<0.000000e+00> : vector<4xf32>
      %38 = vector.multi_reduction <add>, %37, %cst_31 [1] : vector<4x256xf32> to vector<4xf32>
      %c0_32 = arith.constant 0 : index
      %c0_33 = arith.constant 0 : index
      %39 = vector.load %arg8[%c0_32, %c0_33] : memref<4x256xf32, #tpu.memory_space<vmem>>, vector<4x256xf32>
      %cst_34 = arith.constant dense<0.000000e+00> : vector<4xf32>
      %40 = vector.multi_reduction <add>, %39, %cst_34 [1] : vector<4x256xf32> to vector<4xf32>
      %41 = vector.shape_cast %36 : vector<4xf32> to vector<1x4xf32>
      %42 = vector.shape_cast %38 : vector<4xf32> to vector<1x4xf32>
      %43 = vector.shape_cast %40 : vector<4xf32> to vector<1x4xf32>
      %44 = tpu.concatenate %41, %42, %43 in 0 : vector<1x4xf32>, vector<1x4xf32>, vector<1x4xf32> -> vector<3x4xf32>
      %c0_35 = arith.constant 0 : index
      %c0_36 = arith.constant 0 : index
      %c0_37 = arith.constant 0 : index
      %45 = vector.load %arg5[%c0_35, %c0_36, %c0_37] : memref<1x3x4xf32, #tpu.memory_space<vmem>>, vector<1x3x4xf32>
      %46 = vector.shape_cast %45 : vector<1x3x4xf32> to vector<3x4xf32>
      %47 = vector.shape_cast %44 : vector<3x4xf32> to vector<1x3x4xf32>
      tpu.vector_store %arg5[%c0_35, %c0_36, %c0_37], %47 {strides = array<i32>} : memref<1x3x4xf32, #tpu.memory_space<vmem>>, vector<1x3x4xf32>,
    } else {
    }
    return
  }
  func.func @transform_0(%arg0: i32, %arg1: i32, %arg2: i32) -> (i32, i32, i32) {
    %c1_i32 = arith.constant 1 : i32
    %0 = arith.muli %arg0, %c1_i32 : i32
    %1 = arith.addi %0, %arg1 : i32
    %c0_i32 = arith.constant 0 : i32
    %c0_i32_0 = arith.constant 0 : i32
    return %1, %c0_i32, %arg2 : i32, i32, i32
  }
  func.func @transform_1(%arg0: i32, %arg1: i32, %arg2: i32) -> (i32, i32, i32) {
    %c1_i32 = arith.constant 1 : i32
    %0 = arith.muli %arg0, %c1_i32 : i32
    %1 = arith.addi %0, %arg1 : i32
    %c0_i32 = arith.constant 0 : i32
    %c0_i32_0 = arith.constant 0 : i32
    return %1, %c0_i32, %arg2 : i32, i32, i32
  }
  func.func @transform_2(%arg0: i32, %arg1: i32, %arg2: i32) -> (i32, i32, i32) {
    %c0_i32 = arith.constant 0 : i32
    %c0_i32_0 = arith.constant 0 : i32
    %c0_i32_1 = arith.constant 0 : i32
    return %arg0, %c0_i32, %c0_i32_0 : i32, i32, i32
  }
}

</mosaic_0001>

<bundles_post_ra>
// kernel: tpu_custom_call.1
= control target key start
LH: loop header
LB: loop body
LE: loop exit
PB: predicated region body
PF: predicated region fallthrough
CT: control target
= control target key end

     0   :  { %7 = vsyncpa [#allocation6], 0  ;;  %s438_s0 = inlined_call_operand.hbm [shape: f32[2,4,256], index: 0, kind: input, shape index: {}]   ;;  %s439_s1 = inlined_call_operand.hbm [shape: f32[2,4,256], index: 1, kind: input, shape index: {}]   ;;  %s440_s2 = inlined_call_operand.vmem [shape: f32[1,3,4], index: 2, kind: output, shape index: {}]  }
   0x1   :  { %8 = vsyncpa [#allocation8], 0  ;;  %s354_s9 = smov [#allocation5]   ;;  %s306_s13 = scalar_lea.hbm %s438_s0, 256 }
   0x2   :  { %s19_s10 = sshll.u32 %s354_s9, 4  ;;  %p307_p0 = scmp.ne.s32.totalorder %s438_s0, %s306_s13  ;;  %s20_s10 = int_to_ptr.vmem [resolvable:$true] %s19_s10 }
   0x3   :  { %p310_p1 = scmp.lt.u32.totalorder %s306_s13, %s438_s0 }
   0x5   :  { %p312_p2 = pnand %p310_p1, %p307_p0 }
   0x7   :  { %315 = shalt.err (!%p312_p2)
}
   0x8   :  { %s316_s18 = scalar_lea.vmem %s20_s10, 256  ;;  %p321_p4 = scmp.lt.s32.totalorder %s20_s10, %s20_s10 }
   0x9   :  { %p317_p3 = scmp.ne.s32.totalorder %s20_s10, %s316_s18  ;;  %p322_p5 = scmp.lt.s32.totalorder %s316_s18, %s316_s18 }
   0xb   :  { %p323_p6 = por %p322_p5, %p321_p4 }
   0xd   :  { %p324_p7 = pnand %p323_p6, %p317_p3 }
   0xf   :  { %327 = shalt.err (!%p324_p7)
}
  0x10   :  { %s355_s19 = smov 128   ;;  %s356_s20 = smov 8  }
  0x11   :  { %25 = dma.hbm_to_vmem [thread:$0]  %s438_s0, 256, %s20_s10, [#allocation6], %s355_s19, %s355_s19, %s356_s20  }
  0x12   :  { %s357_s23 = smov [#allocation7]   ;;  %s328_s27 = scalar_lea.hbm %s439_s1, 256 }
  0x13   :  { %s36_s24 = sshll.u32 %s357_s23, 4  ;;  %p329_p8 = scmp.ne.s32.totalorder %s439_s1, %s328_s27  ;;  %s37_s24 = int_to_ptr.vmem [resolvable:$true] %s36_s24 }
  0x14   :  { %p332_p9 = scmp.lt.u32.totalorder %s328_s27, %s439_s1 }
  0x16   :  { %p334_p10 = pnand %p332_p9, %p329_p8 }
  0x18   :  { %337 = shalt.err (!%p334_p10)
}
  0x19   :  { %s338_s4 = scalar_lea.vmem %s37_s24, 256  ;;  %p343_p12 = scmp.lt.s32.totalorder %s37_s24, %s37_s24 }
  0x1a   :  { %p339_p11 = scmp.ne.s32.totalorder %s37_s24, %s338_s4  ;;  %p344_p13 = scmp.lt.s32.totalorder %s338_s4, %s338_s4 }
  0x1c   :  { %p345_p0 = por %p344_p13, %p343_p12 }
  0x1e   :  { %p346_p1 = pnand %p345_p0, %p339_p11 }
  0x20   :  { %349 = shalt.err (!%p346_p1)
}
  0x21   :  { %42 = dma.hbm_to_vmem [thread:$0]  %s439_s1, 256, %s37_s24, [#allocation8], %s355_s19, %s355_s19, %s356_s20  }
  0x22   :  { %350 = dma.done.wait [#allocation6], 256  }
  0x23   :  { %351 = vsyncadd [#allocation6], 4294967040 }
  0x24   :  { %352 = dma.done.wait [#allocation8], 256  }
  0x25   :  { %353 = vsyncadd [#allocation8], 4294967040  ;;  %vm72_vm0 = vcmask 1043456   ;;  %v62_v0 = vld [vmem:[#allocation5] sm:$0xff]  ;;  %v63_v1 = vld [vmem:[#allocation5 + $0x8] sm:$0xff]  ;;  %vm271_vm1 = vcmask 1040384  }
  0x26   :  { %v397_v2 = vld [vmem:[#allocation7] sm:$0xff]  ;;  %v399_v3 = vld [vmem:[#allocation7 + $0x8] sm:$0xff]  ;;  %v68_v4 = vcombine.high %v62_v0, %v62_v0  ;;  %v69_v5 = vcombine.high %v63_v1, %v63_v1  ;;  %v73_v6 = vsel %vm72_vm0, %v62_v0, -inf  ;;  %v87_v7 = vsel %vm72_vm0, %v63_v1, -inf }
  0x27   :  { %v74_v8 = vrot.slane %v73_v6, 4  ;;  %v88_v9 = vrot.slane %v87_v7, 4  ;;  %v206_v10 = vcombine.high %v397_v2, %v397_v2  ;;  %v207_v11 = vcombine.high %v399_v3, %v399_v3 }
  0x28   :  { %v80_v12 = vsel %vm72_vm0, %v68_v4, -inf  ;;  %v94_v13 = vsel %vm72_vm0, %v69_v5, -inf  ;;  %v210_v14 = vsel %vm72_vm0, %v397_v2, 0.0  ;;  %v211_v15 = vsel %vm72_vm0, %v399_v3, 0.0 }
  0x29   :  { %v75_v16 = vmax.f32 %v73_v6, %v74_v8  ;;  %v81_v17 = vrot.slane %v80_v12, 4  ;;  %v89_v18 = vmax.f32 %v87_v7, %v88_v9  ;;  %v95_v19 = vrot.slane %v94_v13, 4 }
  0x2a   :  { %v212_v20 = vadd.f32 %v211_v15, %v210_v14  ;;  %v213_v21 = vsel %vm72_vm0, %v206_v10, 0.0  ;;  %v214_v22 = vsel %vm72_vm0, %v207_v11, 0.0  ;;  %vm273_vm2 = vcmask 1041408  }
  0x2b   :  { %v76_v23 = vrot.slane %v75_v16, 2  ;;  %v82_v24 = vmax.f32 %v80_v12, %v81_v17  ;;  %v90_v25 = vrot.slane %v89_v18, 2  ;;  %v96_v26 = vmax.f32 %v94_v13, %v95_v19 }
  0x2c   :  { %v215_v27 = vadd.f32 %v214_v22, %v213_v21  ;;  %vm275_vm3 = vcmask 26624  }
  0x2d   :  { %v77_v28 = vmax.f32 %v75_v16, %v76_v23  ;;  %v83_v29 = vrot.slane %v82_v24, 2  ;;  %v91_v30 = vmax.f32 %v89_v18, %v90_v25  ;;  %v97_v31 = vrot.slane %v96_v26, 2 }
  0x2e   :  { %v218_v32 = vcombine.low %v212_v20, %v215_v27  ;;  %v285_v33 = vcombine.low %v215_v27, %v215_v27 }
  0x2f   :  { %v78_v34 = vrot.slane %v77_v28, 1  ;;  %v84_v35 = vmax.f32 %v82_v24, %v83_v29  ;;  %v92_v36 = vrot.slane %v91_v30, 1  ;;  %v98_v37 = vmax.f32 %v96_v26, %v97_v31 }
  0x30   :  { %v246_v38 = vsel %vm72_vm0, %v218_v32, 0.0  ;;  %v247_v39 = vsel %vm72_vm0, %v285_v33, 0.0 }
  0x31   :  { %v79_v40 = vmax.f32 %v77_v28, %v78_v34  ;;  %v85_v41 = vrot.slane %v84_v35, 1  ;;  %v93_v42 = vmax.f32 %v91_v30, %v92_v36  ;;  %v99_v43 = vrot.slane %v98_v37, 1 }
  0x32   :  { %v248_v44 = vadd.f32 %v247_v39, %v246_v38 }
  0x33   :  { %v86_v45 = vmax.f32 %v84_v35, %v85_v41  ;;  %v100_v46 = vmax.f32 %v98_v37, %v99_v43 }
  0x34   :  { %249 = vadd.xlane.f32.xlu1 %v248_v44 }
  0x35   :  { %v105_v47 = vcombine.low %v79_v40, %v86_v45  ;;  %v106_v48 = vcombine.low %v93_v42, %v100_v46 }
  0x37   :  { %v109_v49 = vsub.f32 %v62_v0, %v105_v47  ;;  %v110_v50 = vsub.f32 %v63_v1, %v106_v48 }
  0x39   :  { %v111_v51 = vmul.f32 1.442695, %v109_v49  ;;  %v113_v52 = vmul.f32 1.442695, %v110_v50 }
  0x3b   :  { %294 = vpow2.f32 %v111_v51 }
  0x3c   :  { %296 = vpow2.f32 %v113_v52 }
  0x45   :  { %v295_v53 = vpop.eup %294 }
  0x46   :  { %v297_v54 = vpop.eup %296  ;;  %v117_v55 = vcombine.high %v295_v53, %v295_v53  ;;  %v121_v56 = vsel %vm72_vm0, %v295_v53, 0.0 }
  0x47   :  { %v118_v57 = vcombine.high %v297_v54, %v297_v54  ;;  %v122_v58 = vrot.slane %v121_v56, 4  ;;  %v135_v59 = vsel %vm72_vm0, %v297_v54, 0.0 }
  0x48   :  { %v128_v60 = vsel %vm72_vm0, %v117_v55, 0.0  ;;  %v136_v61 = vrot.slane %v135_v59, 4 }
  0x49   :  { %v123_v62 = vadd.f32 %v122_v58, %v121_v56  ;;  %v129_v63 = vrot.slane %v128_v60, 4  ;;  %v142_v0 = vsel %vm72_vm0, %v118_v57, 0.0  ;;  %v252_v57 = vlaneseq }
  0x4a   :  { %v137_v1 = vadd.f32 %v136_v61, %v135_v59  ;;  %v143_v4 = vrot.slane %v142_v0, 4 }
  0x4b   :  { %v124_v5 = vrot.slane %v123_v62, 2  ;;  %v130_v6 = vadd.f32 %v129_v63, %v128_v60  ;;  %v253_v58 = vand.u32 127, %v252_v57  ;;  %v255_v59 = vshrl.u32 %v252_v57, 7 }
  0x4c   :  { %v138_v7 = vrot.slane %v137_v1, 2  ;;  %v144_v8 = vadd.f32 %v143_v4, %v142_v0 }
  0x4d   :  { %v125_v9 = vadd.f32 %v124_v5, %v123_v62  ;;  %v131_v10 = vrot.slane %v130_v6, 2  ;;  %v256_v61 = vsub.s32 %v253_v58, %v255_v59 }
  0x4e   :  { %v139_v11 = vadd.f32 %v138_v7, %v137_v1  ;;  %v145_v12 = vrot.slane %v144_v8, 2 }
  0x4f   :  { %v126_v13 = vrot.slane %v125_v9, 1  ;;  %v132_v14 = vadd.f32 %v131_v10, %v130_v6 }
  0x50   :  { %v140_v15 = vrot.slane %v139_v11, 1  ;;  %v146_v16 = vadd.f32 %v145_v12, %v144_v8 }
  0x51   :  { %v127_v17 = vadd.f32 %v126_v13, %v125_v9  ;;  %v133_v18 = vrot.slane %v132_v14, 1 }
  0x52   :  { %v141_v19 = vadd.f32 %v140_v15, %v139_v11  ;;  %v147_v20 = vrot.slane %v146_v16, 1 }
  0x53   :  { %v134_v21 = vadd.f32 %v133_v18, %v132_v14  ;;  %298 = vrcp.f32 %v127_v17 }
  0x54   :  { %v148_v22 = vadd.f32 %v147_v20, %v146_v16  ;;  %300 = vrcp.f32 %v141_v19 }
  0x55   :  { %302 = vrcp.f32 %v134_v21 }
  0x56   :  { %304 = vrcp.f32 %v148_v22 }
  0x5d   :  { %v299_v23 = vpop.eup %298 }
  0x5e   :  { %v301_v24 = vpop.eup %300 }
  0x5f   :  { %v303_v25 = vpop.eup %302 }
  0x60   :  { %v305_v26 = vpop.eup %304  ;;  %v157_v27 = vcombine.low %v299_v23, %v303_v25 }
  0x61   :  { %v158_v28 = vcombine.low %v301_v24, %v305_v26 }
  0x62   :  { %v161_v29 = vmul.f32 %v295_v53, %v157_v27 }
  0x63   :  { %v162_v30 = vmul.f32 %v297_v54, %v158_v28 }
  0x64   :  { %v164_v31 = vmul.f32 %v161_v29, %v397_v2  ;;  %v187_v32 = vcombine.high %v161_v29, %v161_v29  ;;  %v191_v33 = vsel %vm72_vm0, %v161_v29, 0.0 }
  0x65   :  { %v165_v34 = vmul.f32 %v162_v30, %v399_v3  ;;  %v188_v35 = vcombine.high %v162_v30, %v162_v30  ;;  %v192_v36 = vsel %vm72_vm0, %v162_v30, 0.0 }
  0x66   :  { %v168_v37 = vcombine.high %v164_v31, %v164_v31  ;;  %v172_v38 = vsel %vm72_vm0, %v164_v31, 0.0  ;;  %v193_v39 = vadd.f32 %v192_v36, %v191_v33  ;;  %v194_v40 = vsel %vm72_vm0, %v187_v32, 0.0 }
  0x67   :  { %v169_v41 = vcombine.high %v165_v34, %v165_v34  ;;  %v173_v42 = vsel %vm72_vm0, %v165_v34, 0.0  ;;  %v195_v43 = vsel %vm72_vm0, %v188_v35, 0.0 }
  0x68   :  { %v174_v2 = vadd.f32 %v173_v42, %v172_v38  ;;  %v175_v44 = vsel %vm72_vm0, %v168_v37, 0.0  ;;  %v196_v45 = vadd.f32 %v195_v43, %v194_v40 }
  0x69   :  { %v176_v3 = vsel %vm72_vm0, %v169_v41, 0.0 }
  0x6a   :  { %v177_v46 = vadd.f32 %v176_v3, %v175_v44  ;;  %v199_v47 = vcombine.low %v193_v39, %v196_v45  ;;  %v284_v48 = vcombine.low %v196_v45, %v196_v45 }
  0x6c   :  { %v180_v49 = vcombine.low %v174_v2, %v177_v46  ;;  %v283_v50 = vcombine.low %v177_v46, %v177_v46  ;;  %v237_v53 = vsel %vm72_vm0, %v199_v47, 0.0  ;;  %v238_v54 = vsel %vm72_vm0, %v284_v48, 0.0 }
  0x6d   :  { %v239_v56 = vadd.f32 %v238_v54, %v237_v53 }
  0x6e   :  { %v228_v51 = vsel %vm72_vm0, %v180_v49, 0.0  ;;  %v229_v52 = vsel %vm72_vm0, %v283_v50, 0.0 }
  0x6f   :  { %v230_v55 = vadd.f32 %v229_v52, %v228_v51 }
  0x71   :  { %231 = vadd.xlane.f32.xlu0 %v230_v55 }
  0x75   :  { %240 = vadd.xlane.f32.xlu0 %v239_v56 }
  0xc1   :  { %v250_v62 = vpop.xlane.xlu1 %249 }
  0xc2   :  { %v269_v0 = vrot.slane %v250_v62, %v256_v61 }
  0xfe   :  { %v232_v60 = vpop.xlane.xlu0 %231 }
  0xff   :  { %v257_v1 = vrot.slane %v232_v60, %v256_v61 }
 0x102   :  { %v241_v63 = vpop.xlane.xlu0 %240 }
 0x103   :  { %v263_v4 = vrot.slane %v241_v63, %v256_v61 }
 0x105   :  { %v272_v5 = vsel %vm271_vm1, %v257_v1, %v263_v4 }
 0x106   :  { %v274_v6 = vsel %vm273_vm2, %v272_v5, %v269_v0 }
 0x107   :  { %276 = vst.msk [vmem:[%s440_s2] sm:$0x7] %vm275_vm3, %v274_v6 }
 0x108   :  { %281 = vsyncpa [#allocation6], 1 }
 0x109   :  { %282 = vsyncpa [#allocation8], 1 }

</bundles_post_ra>
